<compile_context>
chip_gen: v5e
topology: v5e:2x2
jax: 0.10.0
libtpu: 0.0.40
codegen_flags: <defaults>
</compile_context>

<pallas_src>
import functools
import math

import jax
import jax.numpy as jnp
from jax import lax
from jax.experimental import pallas as pl
from jax.experimental.pallas import tpu as pltpu

LANES = 128
SUBLANES = 8


def _round_up(x, m):
    return (x + m - 1) // m * m


def _chip_params():
    """Pick the block-row cap and core split from the attached TPU generation."""
    kind = ""
    try:
        kind = (jax.devices()[0].device_kind or "").lower()
    except Exception:
        pass
    is_v5e = ("v5e" in kind) or ("v5 lite" in kind) or ("v5litepod" in kind)
    is_v7 = ("v7" in kind) or ("tpu7" in kind) or ("7x" in kind)
    # v5e default scoped-VMEM budget is 16 MiB -> smaller tiles there.
    max_block_rows = 4096 if is_v5e else 8192
    # Only v7x has 2 TensorCores per chip worth sharding the parallel axis over.
    num_cores = 2 if is_v7 else 1
    return max_block_rows, num_cores


def _pow_gamma(u, gamma):
    """(1 - pt) ** gamma; repeated multiplies for small integer gamma (no pow)."""
    if float(gamma) == int(gamma) and 0 <= int(gamma) <= 8:
        g = int(gamma)
        if g == 0:
            return jnp.ones_like(u)
        r = u
        for _ in range(g - 1):
            r = r * u
        return r
    return u ** jnp.float32(gamma)


def _focal_kernel(p_ref, t_ref, o_ref, acc_ref, *, gamma, rows, block_rows,
                  blocks_per_core, needs_mask, hard_targets, scale):
    c = pl.program_id(0)   # core-split index (parallel)
    j = pl.program_id(1)   # block index within the split (arbitrary/reduction)

    @pl.when(j == 0)
    def _():
        acc_ref[...] = jnp.zeros_like(acc_ref)

    p = p_ref[...].astype(jnp.float32)
    t = t_ref[...].astype(jnp.float32)

    if hard_targets:
        # targets in {0,1}: p_t = p if t==1 else 1-p; bce = -clamp(log p_t, -100)
        # and pt = exp(-bce) = max(p_t, e^-100).  1 transcendental per element.
        p_t = jnp.where(t > 0.5, p, 1.0 - p)
        bce = -jnp.maximum(jnp.log(p_t), -100.0)
        pt = jnp.maximum(p_t, jnp.float32(math.exp(-100.0)))
    else:
        # Exact BCELoss(reduction='none') semantics (soft targets supported).
        log_p = jnp.maximum(jnp.log(p), -100.0)
        log_1mp = jnp.maximum(jnp.log(1.0 - p), -100.0)
        bce = -(t * log_p + (1.0 - t) * log_1mp)
        pt = jnp.exp(-bce)

    contrib = _pow_gamma(1.0 - pt, gamma) * bce   # alpha and 1/N folded into scale

    def _accum(x):
        if block_rows % SUBLANES == 0:
            # (block_rows,128) -> (block_rows//8, 8, 128) tree-sum into (8,128).
            acc_ref[...] += x.reshape(-1, SUBLANES, LANES).sum(axis=0)
        else:
            # Rare small-input path (single full-extent block, rows % 8 != 0).
            acc_ref[0:1, :] += jnp.sum(x, axis=0, keepdims=True)

    if needs_mask:
        gb = c * blocks_per_core + j
        is_full = (gb + 1) * block_rows <= rows

        @pl.when(is_full)
        def _():
            _accum(contrib)

        @pl.when(jnp.logical_not(is_full))
        def _():
            # Only the partial tail block (or a clamped duplicate block on an
            # uneven core split) pays for the iota/compare/where.
            row_ids = (lax.broadcasted_iota(jnp.int32, contrib.shape, 0)
                       + gb * block_rows)
            _accum(jnp.where(row_ids < rows, contrib, 0.0))
    else:
        _accum(contrib)

    @pl.when(j == pl.num_programs(1) - 1)
    def _():
        total = jnp.sum(acc_ref[...]) * scale
        o_ref[...] = jnp.broadcast_to(total, o_ref.shape)


def focal_loss(preds, targets, alpha=0.25, gamma=2.0, hard_targets=False):
    """Pallas TPU focal loss.

    preds/targets: probabilities / labels of identical shape (any rank).
    Pass bf16 inputs where acceptable to halve HBM traffic; the kernel upcasts
    to f32 internally.  Set hard_targets=True only if targets are {0,1}.
    """
    assert preds.shape == targets.shape
    n_elems = preds.size
    scale = float(alpha) / float(n_elems)

    p_flat = preds.reshape(-1)
    t_flat = targets.reshape(-1)

    # Lane-aligned prefix goes through the kernel; the (<128-element) ragged
    # tail is computed in plain JAX so the full array is never padded.
    n_main = (n_elems // LANES) * LANES
    tail = n_elems - n_main

    total = jnp.float32(0.0)
    if tail:
        p_tail = p_flat[n_main:].astype(jnp.float32)
        t_tail = t_flat[n_main:].astype(jnp.float32)
        log_p = jnp.maximum(jnp.log(p_tail), -100.0)
        log_1mp = jnp.maximum(jnp.log(1.0 - p_tail), -100.0)
        bce = -(t_tail * log_p + (1.0 - t_tail) * log_1mp)
        pt = jnp.exp(-bce)
        total = total + jnp.sum(_pow_gamma(1.0 - pt, float(gamma)) * bce) * scale

    if n_main == 0:
        return total

    rows = n_main // LANES
    p2d = p_flat[:n_main].reshape(rows, LANES)
    t2d = t_flat[:n_main].reshape(rows, LANES)

    max_block_rows, num_cores = _chip_params()
    # A single full-extent block (any row count) when it fits; otherwise a
    # multiple-of-8 cap with a standard partial last block.
    block_rows = rows if rows <= max_block_rows else max_block_rows
    num_blocks = pl.cdiv(rows, block_rows)
    splits = num_cores if num_blocks >= num_cores else 1
    blocks_per_core = pl.cdiv(num_blocks, splits)
    needs_mask = (
        (rows % block_rows != 0)
        or (splits * blocks_per_core != num_blocks)
    )

    def in_map(c, j):
        # Clamp so out-of-range logical blocks (fully masked in-kernel) still
        # issue an in-bounds DMA.
        return (jnp.minimum(c * blocks_per_core + j, num_blocks - 1), 0)

    kernel = functools.partial(
        _focal_kernel,
        gamma=float(gamma),
        rows=rows,
        block_rows=block_rows,
        blocks_per_core=blocks_per_core,
        needs_mask=bool(needs_mask),
        hard_targets=bool(hard_targets),
        scale=scale,
    )

    # 2 pipeline buffers per input + (8,128) accumulator/output + headroom.
    in_block_bytes = block_rows * LANES * (p2d.dtype.itemsize + t2d.dtype.itemsize)
    vmem_limit = int(2 * in_block_bytes + (6 << 20))

    out = pl.pallas_call(
        kernel,
        out_shape=jax.ShapeDtypeStruct((splits * SUBLANES, LANES), jnp.float32),
        grid_spec=pltpu.PrefetchScalarGridSpec(
            num_scalar_prefetch=0,
            grid=(splits, blocks_per_core),
            in_specs=[
                pl.BlockSpec((block_rows, LANES), in_map),
                pl.BlockSpec((block_rows, LANES), in_map),
            ],
            out_specs=pl.BlockSpec((SUBLANES, LANES), lambda c, j: (c, 0)),
            scratch_shapes=[pltpu.VMEM((SUBLANES, LANES), jnp.float32)],
        ),
        compiler_params=pltpu.CompilerParams(
            dimension_semantics=("parallel", "arbitrary"),
            vmem_limit_bytes=vmem_limit,
        ),
    )(p2d, t2d)

    # Each core-split fills its (8,128) output block with its partial sum
    # (already scaled by alpha/N); add one element per block plus the tail.
    return total + jnp.sum(out[::SUBLANES, 0])


def focal_loss_ref(preds, targets, alpha=0.25, gamma=2.0):
    p = preds.astype(jnp.float32)
    t = targets.astype(jnp.float32)
    log_p = jnp.maximum(jnp.log(p), -100.0)
    log_1mp = jnp.maximum(jnp.log(1.0 - p), -100.0)
    bce = -(t * log_p + (1.0 - t) * log_1mp)
    pt = jnp.exp(-bce)
    return jnp.mean(alpha * (1.0 - pt) ** gamma * bce)


if __name__ == "__main__":
    key = jax.random.PRNGKey(0)
    kp, kt = jax.random.split(key)
    B, C, H, W = 2, 4, 16, 16
    # preds must be probabilities in (0, 1); targets are {0, 1} masks.
    preds = jax.nn.sigmoid(jax.random.normal(kp, (B, C, H, W), jnp.float32))
    targets = (jax.random.uniform(kt, (B, C, H, W)) > 0.5).astype(jnp.float32)

    # 1) Exact soft-target path.
    out = focal_loss(preds, targets)
    jax.block_until_ready(out)
    ref = focal_loss_ref(preds, targets)
    assert jnp.allclose(out, ref, rtol=1e-5, atol=1e-6), (out, ref)

    # 2) Hard-target fast path (targets are {0,1} here, so it must match too).
    out_h = focal_loss(preds, targets, hard_targets=True)
    jax.block_until_ready(out_h)
    assert jnp.allclose(out_h, ref, rtol=1e-5, atol=1e-6), (out_h, ref)

    # 3) bf16 inputs (halved HBM traffic); reference on the bf16-rounded data.
    preds_bf = preds.astype(jnp.bfloat16)
    targets_bf = targets.astype(jnp.bfloat16)
    out_bf = focal_loss(preds_bf, targets_bf)
    jax.block_until_ready(out_bf)
    ref_bf = focal_loss_ref(preds_bf, targets_bf)
    assert jnp.allclose(out_bf, ref_bf, rtol=1e-4, atol=1e-6), (out_bf, ref_bf)

    # 4) Non-128-aligned element count (exercises the JAX tail + full-extent
    #    odd-row block path, no padding of the full array).
    kp2, kt2 = jax.random.split(jax.random.PRNGKey(1))
    preds2 = jax.nn.sigmoid(jax.random.normal(kp2, (3, 5, 7, 11), jnp.float32))
    targets2 = (jax.random.uniform(kt2, (3, 5, 7, 11)) > 0.5).astype(jnp.float32)
    out2 = focal_loss(preds2, targets2)
    jax.block_until_ready(out2)
    ref2 = focal_loss_ref(preds2, targets2)
    assert jnp.allclose(out2, ref2, rtol=1e-5, atol=1e-6), (out2, ref2)

    print("KERNEL_OK")
</pallas_src>

<mosaic_0001>
module attributes {stable_mosaic.version = 11 : i64} {
  func.func @_focal_kernel(%arg0: i32, %arg1: i32, %arg2: memref<16x128xf32, #tpu.memory_space<vmem>>, %arg3: memref<16x128xf32, #tpu.memory_space<vmem>>, %arg4: memref<8x128xf32, #tpu.memory_space<vmem>>, %arg5: memref<8x128xf32, #tpu.memory_space<vmem>>) attributes {dimension_semantics = [#tpu.dimension_semantics<parallel>, #tpu.dimension_semantics<arbitrary>], iteration_bounds = array<i64: 1, 1>, scalar_prefetch = 0 : i64, scratch_operands = 1 : i64, tpu.core_type = #tpu.core_type<tc>, window_params = [{transform_indices = @transform_0, window_bounds = array<i64: 16, 128>}, {transform_indices = @transform_1, window_bounds = array<i64: 16, 128>}, {transform_indices = @transform_2, window_bounds = array<i64: 8, 128>}]} {
    %c0_i32 = arith.constant 0 : i32
    %0 = arith.cmpi eq, %arg1, %c0_i32 : i32
    %1 = arith.extui %0 : i1 to i32
    %c0_i32_0 = arith.constant 0 : i32
    %2 = arith.cmpi ne, %1, %c0_i32_0 : i32
    scf.if %2 {
      %cst_17 = arith.constant 0.000000e+00 : f32
      %35 = vector.broadcast %cst_17 : f32 to vector<8x128xf32>
      %c0_18 = arith.constant 0 : index
      %c0_19 = arith.constant 0 : index
      %36 = vector.load %arg5[%c0_18, %c0_19] : memref<8x128xf32, #tpu.memory_space<vmem>>, vector<8x128xf32>
      tpu.vector_store %arg5[%c0_18, %c0_19], %35 {strides = array<i32>} : memref<8x128xf32, #tpu.memory_space<vmem>>, vector<8x128xf32>,
    } else {
    }
    %c0 = arith.constant 0 : index
    %c0_1 = arith.constant 0 : index
    %3 = vector.load %arg2[%c0, %c0_1] : memref<16x128xf32, #tpu.memory_space<vmem>>, vector<16x128xf32>
    %c0_2 = arith.constant 0 : index
    %c0_3 = arith.constant 0 : index
    %4 = vector.load %arg3[%c0_2, %c0_3] : memref<16x128xf32, #tpu.memory_space<vmem>>, vector<16x128xf32>
    %5 = math.log %3 : vector<16x128xf32>
    %cst = arith.constant -1.000000e+02 : f32
    %6 = vector.broadcast %cst : f32 to vector<16x128xf32>
    %7 = arith.maximumf %5, %6 : vector<16x128xf32>
    %cst_4 = arith.constant 1.000000e+00 : f32
    %8 = vector.broadcast %cst_4 : f32 to vector<16x128xf32>
    %9 = arith.subf %8, %3 : vector<16x128xf32>
    %10 = math.log %9 : vector<16x128xf32>
    %cst_5 = arith.constant -1.000000e+02 : f32
    %11 = vector.broadcast %cst_5 : f32 to vector<16x128xf32>
    %12 = arith.maximumf %10, %11 : vector<16x128xf32>
    %13 = arith.mulf %4, %7 : vector<16x128xf32>
    %cst_6 = arith.constant 1.000000e+00 : f32
    %14 = vector.broadcast %cst_6 : f32 to vector<16x128xf32>
    %15 = arith.subf %14, %4 : vector<16x128xf32>
    %16 = arith.mulf %15, %12 : vector<16x128xf32>
    %17 = arith.addf %13, %16 : vector<16x128xf32>
    %cst_7 = arith.constant 0.000000e+00 : f32
    %18 = vector.broadcast %cst_7 : f32 to vector<16x128xf32>
    %19 = arith.subf %18, %17 : vector<16x128xf32>
    %cst_8 = arith.constant 0.000000e+00 : f32
    %20 = vector.broadcast %cst_8 : f32 to vector<16x128xf32>
    %21 = arith.subf %20, %19 : vector<16x128xf32>
    %22 = math.exp %21 : vector<16x128xf32>
    %cst_9 = arith.constant 1.000000e+00 : f32
    %23 = vector.broadcast %cst_9 : f32 to vector<16x128xf32>
    %24 = arith.subf %23, %22 : vector<16x128xf32>
    %25 = arith.mulf %24, %24 : vector<16x128xf32>
    %26 = arith.mulf %25, %19 : vector<16x128xf32>
    %c0_10 = arith.constant 0 : index
    %c0_11 = arith.constant 0 : index
    %27 = vector.load %arg5[%c0_10, %c0_11] : memref<8x128xf32, #tpu.memory_space<vmem>>, vector<8x128xf32>
    %28 = vector.shape_cast %26 : vector<16x128xf32> to vector<2x8x128xf32>
    %cst_12 = arith.constant dense<0.000000e+00> : vector<8x128xf32>
    %29 = vector.multi_reduction <add>, %28, %cst_12 [0] : vector<2x8x128xf32> to vector<8x128xf32>
    %30 = arith.addf %27, %29 : vector<8x128xf32>
    %c0_13 = arith.constant 0 : index
    %c0_14 = arith.constant 0 : index
    %31 = vector.load %arg5[%c0_13, %c0_14] : memref<8x128xf32, #tpu.memory_space<vmem>>, vector<8x128xf32>
    tpu.vector_store %arg5[%c0_13, %c0_14], %30 {strides = array<i32>} : memref<8x128xf32, #tpu.memory_space<vmem>>, vector<8x128xf32>,
    %c0_i32_15 = arith.constant 0 : i32
    %32 = arith.cmpi eq, %arg1, %c0_i32_15 : i32
    %33 = arith.extui %32 : i1 to i32
    %c0_i32_16 = arith.constant 0 : i32
    %34 = arith.cmpi ne, %33, %c0_i32_16 : i32
    scf.if %34 {
      %c0_17 = arith.constant 0 : index
      %c0_18 = arith.constant 0 : index
      %35 = vector.load %arg5[%c0_17, %c0_18] : memref<8x128xf32, #tpu.memory_space<vmem>>, vector<8x128xf32>
      %36 = vector.shape_cast %35 : vector<8x128xf32> to vector<1x8x128xf32>
      %cst_19 = arith.constant dense<0.000000e+00> : vector<1xf32>
      %37 = vector.multi_reduction <add>, %36, %cst_19 [1, 2] : vector<1x8x128xf32> to vector<1xf32>
      %38 = vector.shape_cast %37 : vector<1xf32> to vector<1x1x1xf32>
      %39 = vector.extract %38[0, 0, 0] : f32 from vector<1x1x1xf32>
      %cst_20 = arith.constant 1.22070313E-4 : f32
      %40 = arith.mulf %39, %cst_20 : f32
      %41 = vector.broadcast %40 : f32 to vector<8x128xf32>
      %c0_21 = arith.constant 0 : index
      %c0_22 = arith.constant 0 : index
      %42 = vector.load %arg4[%c0_21, %c0_22] : memref<8x128xf32, #tpu.memory_space<vmem>>, vector<8x128xf32>
      tpu.vector_store %arg4[%c0_21, %c0_22], %41 {strides = array<i32>} : memref<8x128xf32, #tpu.memory_space<vmem>>, vector<8x128xf32>,
    } else {
    }
    return
  }
  func.func @transform_0(%arg0: i32, %arg1: i32) -> (i32, i32) {
    %c1_i32 = arith.constant 1 : i32
    %0 = arith.muli %arg0, %c1_i32 : i32
    %1 = arith.addi %0, %arg1 : i32
    %c0_i32 = arith.constant 0 : i32
    %2 = arith.minsi %1, %c0_i32 : i32
    %c0_i32_0 = arith.constant 0 : i32
    %c0_i32_1 = arith.constant 0 : i32
    return %2, %c0_i32_0 : i32, i32
  }
  func.func @transform_1(%arg0: i32, %arg1: i32) -> (i32, i32) {
    %c1_i32 = arith.constant 1 : i32
    %0 = arith.muli %arg0, %c1_i32 : i32
    %1 = arith.addi %0, %arg1 : i32
    %c0_i32 = arith.constant 0 : i32
    %2 = arith.minsi %1, %c0_i32 : i32
    %c0_i32_0 = arith.constant 0 : i32
    %c0_i32_1 = arith.constant 0 : i32
    return %2, %c0_i32_0 : i32, i32
  }
  func.func @transform_2(%arg0: i32, %arg1: i32) -> (i32, i32) {
    %c0_i32 = arith.constant 0 : i32
    %c0_i32_0 = arith.constant 0 : i32
    return %arg0, %c0_i32 : i32, i32
  }
}

</mosaic_0001>

<bundles_post_ra>
// kernel: tpu_custom_call.1
= control target key start
LH: loop header
LB: loop body
LE: loop exit
PB: predicated region body
PF: predicated region fallthrough
CT: control target
= control target key end

     0   :  { %7 = vsyncpa [#allocation4], 0  ;;  %s277_s0 = inlined_call_operand.hbm [shape: f32[16,128], index: 0, kind: input, shape index: {}]   ;;  %s278_s1 = inlined_call_operand.hbm [shape: f32[16,128], index: 1, kind: input, shape index: {}]   ;;  %s279_s2 = inlined_call_operand.hbm [shape: f32[8,128], index: 2, kind: output, shape index: {}]  }
   0x1   :  { %8 = vsyncpa [#allocation7], 0 }
   0x2   :  { %9 = vsyncpa [#allocation5], 0  ;;  %s20_s11 = sshll.u32 %s277_s0, 4  ;;  %s248_s12 = smov [#allocation3]   ;;  %s21_s11 = int_to_ptr.hbm [resolvable:$true] %s20_s11 }
   0x3   :  { %s22_s13 = sshll.u32 %s248_s12, 4  ;;  %s39_s16 = sshll.u32 %s278_s1, 4  ;;  %s23_s13 = int_to_ptr.vmem [resolvable:$true] %s22_s13  ;;  %s40_s16 = int_to_ptr.hbm [resolvable:$true] %s39_s16 }
   0x4   :  { %s249_s17 = smov 128   ;;  %s250_s18 = smov 8  }
   0x5   :  { %28 = dma.hbm_to_vmem [thread:$0]  %s21_s11, 256, %s23_s13, [#allocation4], %s249_s17, %s249_s17, %s250_s18  }
   0x6   :  { %s251_s19 = smov [#allocation6]  }
   0x7   :  { %s41_s20 = sshll.u32 %s251_s19, 4  ;;  %s42_s20 = int_to_ptr.vmem [resolvable:$true] %s41_s20 }
   0x8   :  { %47 = dma.hbm_to_vmem [thread:$0]  %s40_s16, 256, %s42_s20, [#allocation7], %s249_s17, %s249_s17, %s250_s18  }
   0x9   :  { %242 = dma.done.wait [#allocation4], 256  }
   0xa   :  { %243 = vsyncadd [#allocation4], 4294967040 }
   0xb   :  { %244 = dma.done.wait [#allocation7], 256  }
   0xc   :  { %245 = vsyncadd [#allocation7], 4294967040  ;;  %v69_v0 = vld [vmem:[#allocation3] sm:$0xff]  ;;  %v70_v1 = vld [vmem:[#allocation3 + $0x8] sm:$0xff]  ;;  %s252_s0 = smov [#allocation8]   ;;  %s136_s23 = sshll.u32 %s279_s2, 4  ;;  %s137_s23 = int_to_ptr.hbm [resolvable:$true] %s136_s23 }
   0xd   :  { %158 = vlog2.f32 %v69_v0  ;;  %v79_v2 = vsub.f32 1.0, %v69_v0  ;;  %v80_v3 = vsub.f32 1.0, %v70_v1  ;;  %v71_v5 = vld [vmem:[#allocation6] sm:$0xff]  ;;  %v72_v7 = vld [vmem:[#allocation6 + $0x8] sm:$0xff]  ;;  %s134_s1 = sshll.u32 %s252_s0, 4  ;;  %s135_s1 = int_to_ptr.vmem [resolvable:$true] %s134_s1 }
   0xe   :  { %160 = vlog2.f32 %v70_v1  ;;  %v89_v14 = vsub.f32 1.0, %v71_v5  ;;  %v90_v17 = vsub.f32 1.0, %v72_v7 }
   0xf   :  { %162 = vlog2.f32 %v79_v2 }
  0x10   :  { %164 = vlog2.f32 %v80_v3 }
  0x13   :  { %v159_v4 = vpop.eup %158 }
  0x14   :  { %v161_v6 = vpop.eup %160  ;;  %v74_v8 = vmul.f32 0.6931472, %v159_v4 }
  0x15   :  { %v163_v9 = vpop.eup %162  ;;  %v76_v10 = vmul.f32 0.6931472, %v161_v6 }
  0x16   :  { %v165_v11 = vpop.eup %164  ;;  %v77_v12 = vmax.f32 %v74_v8, -100.0  ;;  %v82_v13 = vmul.f32 0.6931472, %v163_v9 }
  0x17   :  { %v78_v15 = vmax.f32 %v76_v10, -100.0  ;;  %v84_v16 = vmul.f32 0.6931472, %v165_v11 }
  0x18   :  { %v85_v18 = vmax.f32 %v82_v13, -100.0  ;;  %v87_v19 = vmul.f32 %v77_v12, %v71_v5 }
  0x19   :  { %v86_v20 = vmax.f32 %v84_v16, -100.0  ;;  %v88_v21 = vmul.f32 %v78_v15, %v72_v7 }
  0x1a   :  { %v91_v22 = vmul.f32 %v89_v14, %v85_v18 }
  0x1b   :  { %v92_v23 = vmul.f32 %v90_v17, %v86_v20 }
  0x1c   :  { %v93_v24 = vadd.f32 %v91_v22, %v87_v19 }
  0x1d   :  { %v94_v25 = vadd.f32 %v92_v23, %v88_v21 }
  0x1e   :  { %v95_v26 = vsub.f32 0.0, %v93_v24 }
  0x1f   :  { %v96_v27 = vsub.f32 0.0, %v94_v25 }
  0x20   :  { %v97_v28 = vsub.f32 0.0, %v95_v26 }
  0x21   :  { %v98_v29 = vsub.f32 0.0, %v96_v27 }
  0x22   :  { %v99_v30 = vmul.f32 1.442695, %v97_v28 }
  0x23   :  { %v101_v31 = vmul.f32 1.442695, %v98_v29 }
  0x24   :  { %166 = vpow2.f32 %v99_v30 }
  0x25   :  { %168 = vpow2.f32 %v101_v31 }
  0x2a   :  { %v167_v32 = vpop.eup %166 }
  0x2b   :  { %v169_v33 = vpop.eup %168  ;;  %v103_v34 = vsub.f32 1.0, %v167_v32 }
  0x2c   :  { %v104_v35 = vsub.f32 1.0, %v169_v33 }
  0x2d   :  { %v105_v36 = vmul.f32 %v103_v34, %v103_v34 }
  0x2e   :  { %v106_v37 = vmul.f32 %v104_v35, %v104_v35 }
  0x2f   :  { %v107_v38 = vmul.f32 %v105_v36, %v95_v26 }
  0x30   :  { %v108_v39 = vmul.f32 %v106_v37, %v96_v27 }
  0x32   :  { %v110_v40 = vadd.f32 %v108_v39, %v107_v38 }
  0x34   :  { %117 = vadd.xlane.f32.xlu0 %v110_v40 }
  0xa7   :  { %v118_v41 = vpop.xlane.xlu0 %117 }
  0xa8   :  { %v119_v42 = vrot.slane %v118_v41, 4 }
  0xaa   :  { %v120_v43 = vadd.f32 %v119_v42, %v118_v41 }
  0xac   :  { %v121_v44 = vrot.slane %v120_v43, 2 }
  0xae   :  { %v122_v45 = vadd.f32 %v121_v44, %v120_v43 }
  0xb0   :  { %v123_v46 = vrot.slane %v122_v45, 1 }
  0xb2   :  { %v124_v47 = vadd.f32 %v123_v46, %v122_v45 }
  0xb4   :  { %151 = vpush %v124_v47 }
  0xe5   :  { %s152_s24 = spop %151 }
  0xe6   :  { %s126_s25 = smul.f32 0.00012207031, %s152_s24 }
  0xe8   :  { %v127_v48 = vstv %s126_s25 }
  0xe9   :  { %128 = vst [vmem:[#allocation8] sm:$0xff] %v127_v48 }
  0xea   :  { %139 = dma.vmem_to_hbm [thread:$0]  %s135_s1, 128, %s137_s23, [#allocation5]  }
  0xeb   :  { %246 = dma.done.wait [#allocation5], 128  }
  0xec   :  { %247 = vsyncadd [#allocation5], 4294967168 }
  0xed   :  { %144 = vsyncpa [#allocation4], 1 }
  0xee   :  { %145 = vsyncpa [#allocation7], 1 }
  0xef   :  { %146 = vsyncpa [#allocation5], 1 }

</bundles_post_ra>
